<compile_context>
chip_gen: v5e
topology: v5e:2x2
jax: 0.10.0
libtpu: 0.0.40
codegen_flags: <defaults>
</compile_context>

<pallas_src>
import functools

import jax
import jax.numpy as jnp
from jax.experimental import pallas as pl
from jax.experimental.pallas import tpu as pltpu


_LANE_COLS = 1024  # 8 * 128 -> lane-dense slab width, unmasked vld/vst


def _scale_kernel(x_ref, o_ref, *, scale):
    # Elementwise multiply on the whole VMEM tile (VPU). Compute in f32 so the
    # scale constant isn't rounded to a low-precision input dtype, then cast
    # back to the output dtype (no-op for f32 inputs).
    x = x_ref[...]
    o_ref[...] = (x.astype(jnp.float32) * jnp.float32(scale)).astype(o_ref.dtype)


@functools.lru_cache(maxsize=None)
def _pick_block_bytes():
    """Per-generation DMA block size (bytes per buffer)."""
    try:
        kind = jax.devices()[0].device_kind.lower()
    except Exception:
        return 4 << 20
    if "v5" in kind:
        return 2 << 20          # ~5us/step of DMA already; bigger buys nothing
    if "v4" in kind or "v6" in kind:
        return 4 << 20          # on the 85% HBM-roofline plateau
    return 8 << 20              # v7x+: 3.2 TB/s/TC, amortize ~0.35us step cost


def _scale_2d(x2d, scale, out_dtype):
    """Run the Pallas kernel on a (rows, 1024) lane-dense slab."""
    rows, cols = x2d.shape
    itemsize = jnp.dtype(out_dtype).itemsize
    block_bytes = _pick_block_bytes()

    target_rows = max(1, block_bytes // (cols * itemsize))
    block_rows = min(target_rows, rows)

    # Keep >=2 grid steps when possible so dimension_semantics=("parallel",)
    # actually shards across both v7x TensorCores for mid-size tensors.
    if rows >= 64:
        half = -(-rows // 2)
        half = ((half + 31) // 32) * 32
        block_rows = min(block_rows, half)

    # Sublane alignment (32 covers f32/bf16/int8 packing); ragged final block
    # along the row axis is masked by Pallas, so rows need not divide evenly.
    if block_rows >= 32:
        block_rows -= block_rows % 32
    elif block_rows >= 8:
        block_rows -= block_rows % 8
    else:
        block_rows = rows  # tiny: single full-extent block (always legal)

    grid = (pl.cdiv(rows, block_rows),)

    # in + out, double-buffered -> 4 buffers; add headroom, stay <= 48 MiB so
    # it is legal even on v7x's 64 MiB physical VMEM.
    buf_bytes = block_rows * cols * itemsize
    vmem_limit = min(48 << 20, max(32 << 20, 4 * buf_bytes + (8 << 20)))

    return pl.pallas_call(
        functools.partial(_scale_kernel, scale=scale),
        out_shape=jax.ShapeDtypeStruct((rows, cols), out_dtype),
        grid_spec=pltpu.PrefetchScalarGridSpec(
            num_scalar_prefetch=0,
            grid=grid,
            in_specs=[pl.BlockSpec((block_rows, cols), lambda i: (i, 0))],
            out_specs=pl.BlockSpec((block_rows, cols), lambda i: (i, 0)),
        ),
        compiler_params=pltpu.CompilerParams(
            dimension_semantics=("parallel",),
            vmem_limit_bytes=vmem_limit,
        ),
        cost_estimate=pl.CostEstimate(
            flops=rows * cols,
            transcendentals=0,
            bytes_accessed=2 * rows * cols * itemsize,
        ),
    )(x2d)


def _scale_plain(x, scale, dtype):
    """Plain XLA multiply, numerically identical to the kernel path."""
    if jnp.issubdtype(dtype, jnp.floating):
        return (x.astype(jnp.float32) * jnp.float32(scale)).astype(dtype)
    # Integer dtypes: native integer multiply (torch-style wraparound is what
    # XLA does for int32/int64; no f32 intermediate to lose precision).
    return x * scale


def normalize_sample_transform(x, scale=37060, *, min_pallas_bytes=512 * 1024):
    """Pallas equivalent of NormalizeSampleTransform.forward: x * scale.

    Shape and dtype are preserved. Small tensors and integer dtypes use a
    plain XLA multiply; large float tensors stream through the Pallas kernel.
    """
    dtype = x.dtype
    n = x.size
    itemsize = jnp.dtype(dtype).itemsize

    # Fast path: integer dtypes, empty, or small tensors -> fused XLA multiply
    # beats a kernel launch + reshapes.
    if (not jnp.issubdtype(dtype, jnp.floating)
            or n == 0
            or n * itemsize < min_pallas_bytes
            or n < _LANE_COLS):
        return _scale_plain(x, scale, dtype)

    flat = x.reshape(-1)                       # free for contiguous inputs
    n_aligned = (n // _LANE_COLS) * _LANE_COLS

    if n_aligned == n:
        # Zero-copy path: pure bitcast reshapes around the kernel.
        out_flat = _scale_2d(flat.reshape(-1, _LANE_COLS), scale, dtype).reshape(-1)
    else:
        # Ragged tail (<1024 elems): kernel on the aligned prefix, tiny tail in
        # plain JAX, stitch back together. No full-size jnp.pad round trip.
        head = _scale_2d(flat[:n_aligned].reshape(-1, _LANE_COLS), scale, dtype)
        tail = _scale_plain(flat[n_aligned:], scale, dtype)
        out_flat = jnp.concatenate([head.reshape(-1), tail])

    return out_flat.reshape(x.shape)


if __name__ == "__main__":
    scale = 37060
    key = jax.random.PRNGKey(0)
    k1, k2, k3 = jax.random.split(key, 3)

    # 1) Small NCHW input consistent with the module (batch=2, channels=4,
    #    spatial 16x16) -> small-input fast path.
    x_small = jax.random.normal(k1, (2, 4, 16, 16), dtype=jnp.float32)
    y_small = jax.block_until_ready(normalize_sample_transform(x_small, scale))
    assert y_small.shape == x_small.shape and y_small.dtype == x_small.dtype
    assert jnp.allclose(y_small, x_small * scale, rtol=1e-6, atol=1e-2)

    # 2) 1024-aligned input -> zero-copy Pallas path (force past the fast path).
    x_al = jax.random.normal(k2, (2, 4, 128, 128), dtype=jnp.float32)  # 131072 elems
    y_al = jax.block_until_ready(
        normalize_sample_transform(x_al, scale, min_pallas_bytes=0))
    assert y_al.shape == x_al.shape and y_al.dtype == x_al.dtype
    assert jnp.allclose(y_al, x_al * scale, rtol=1e-6, atol=1e-2)

    #    bf16 variant through the kernel (f32 compute, bf16 store).
    x_bf = x_al.astype(jnp.bfloat16)
    y_bf = jax.block_until_ready(
        normalize_sample_transform(x_bf, scale, min_pallas_bytes=0))
    ref_bf = (x_bf.astype(jnp.float32) * jnp.float32(scale)).astype(jnp.bfloat16)
    assert y_bf.dtype == jnp.bfloat16
    assert jnp.allclose(y_bf.astype(jnp.float32), ref_bf.astype(jnp.float32),
                        rtol=2e-2, atol=1.0)

    # 3) Ragged input (numel % 1024 != 0, ragged row blocks) -> prefix kernel
    #    + plain-JAX tail path.
    x_rg = jax.random.normal(k3, (3, 5, 7, 11, 13), dtype=jnp.float32)  # 15015 elems
    y_rg = jax.block_until_ready(
        normalize_sample_transform(x_rg, scale, min_pallas_bytes=0))
    assert y_rg.shape == x_rg.shape and y_rg.dtype == x_rg.dtype
    assert jnp.allclose(y_rg, x_rg * scale, rtol=1e-6, atol=1e-2)

    print("KERNEL_OK")
</pallas_src>

<mosaic_0001>
module attributes {stable_mosaic.version = 11 : i64} {
  func.func @_scale_kernel(%arg0: i32, %arg1: memref<64x1024xf32, #tpu.memory_space<vmem>>, %arg2: memref<64x1024xf32, #tpu.memory_space<vmem>>) attributes {dimension_semantics = [#tpu.dimension_semantics<parallel>], iteration_bounds = array<i64: 2>, scalar_prefetch = 0 : i64, scratch_operands = 0 : i64, tpu.core_type = #tpu.core_type<tc>, window_params = [{transform_indices = @transform_0, window_bounds = array<i64: 64, 1024>}, {transform_indices = @transform_1, window_bounds = array<i64: 64, 1024>}]} {
    %c0 = arith.constant 0 : index
    %c0_0 = arith.constant 0 : index
    %0 = vector.load %arg1[%c0, %c0_0] : memref<64x1024xf32, #tpu.memory_space<vmem>>, vector<64x1024xf32>
    %cst = arith.constant 3.706000e+04 : f32
    %1 = vector.broadcast %cst : f32 to vector<64x1024xf32>
    %2 = arith.mulf %0, %1 : vector<64x1024xf32>
    %c0_1 = arith.constant 0 : index
    %c0_2 = arith.constant 0 : index
    %3 = vector.load %arg2[%c0_1, %c0_2] : memref<64x1024xf32, #tpu.memory_space<vmem>>, vector<64x1024xf32>
    tpu.vector_store %arg2[%c0_1, %c0_2], %2 {strides = array<i32>} : memref<64x1024xf32, #tpu.memory_space<vmem>>, vector<64x1024xf32>,
    return
  }
  func.func @transform_0(%arg0: i32) -> (i32, i32) {
    %c0_i32 = arith.constant 0 : i32
    %c0_i32_0 = arith.constant 0 : i32
    return %arg0, %c0_i32 : i32, i32
  }
  func.func @transform_1(%arg0: i32) -> (i32, i32) {
    %c0_i32 = arith.constant 0 : i32
    %c0_i32_0 = arith.constant 0 : i32
    return %arg0, %c0_i32 : i32, i32
  }
}

</mosaic_0001>

<bundles_post_ra>
// kernel: tpu_custom_call.1
= control target key start
LH: loop header
LB: loop body
LE: loop exit
PB: predicated region body
PF: predicated region fallthrough
CT: control target
= control target key end

     0   :  { %6 = vsyncpa [#allocation3], 0  ;;  %s864_s0 = inlined_call_operand.hbm [shape: f32[128,1024], index: 0, kind: input, shape index: {}]   ;;  %s865_s1 = inlined_call_operand.hbm [shape: f32[128,1024], index: 1, kind: output, shape index: {}]  }
   0x1   :  { %8 = vsyncpa [#allocation3 + $0x1], 0 }
   0x2   :  { %9 = vsyncpa [#allocation4], 0 }
   0x3   :  { %11 = vsyncpa [#allocation4 + $0x1], 0  ;;  %s604_s6 = smov 0   ;;  %s606_s7 = smov 0  }
   0x4   :  { %s608_s8 = smov 0   ;;  %s610_s9 = smov 0  }
   0x5 LB: > { %s625_s10 = sadd.s32 4294967295, %s588_s9   ;;  %s422_s11 = sadd.s32 4294967294, %s588_s9   ;;  %s588_s9 = sphi %s610_s9, %s875_s9   ;;  %s584_s8 = sphi %s608_s8, %s874_s8   ;;  %s580_s7 = sphi %s606_s7, %s873_s7   ;;  %s576_s6 = sphi %s604_s6, %s872_s6  }
   0x6   : > { %s629_s12 = sadd.s32 1, %s588_s9   ;;  %s24_s13 = sadd.s32 1, %s584_s8 }
   0x7   : > { %s21_s14 = ssub.s32 %s588_s9, %s629_s12  ;;  %p31_p0 = scmp.ne.s32.totalorder %s584_s8, %s580_s7 }
   0x8   : > { %p22_p1 = scmp.eq.s32.totalorder %s21_s14, 0  ;;  %p32_p2 = scmp.eq.s32.totalorder %s588_s9, 0 }
   0x9   : > { %p37_p3 = scmp.ne.s32.totalorder %s580_s7, %s576_s6  ;;  %p38_p4 = scmp.eq.s32.totalorder %s625_s10, 0 }
   0xa   : > { %s641_s15 = scalar_select %p22_p1, %s584_s8, %s24_s13  }
   0xb   : > { %p643_p5 = por %p32_p2, %p31_p0  ;;  %p647_p6 = por %p38_p4, %p37_p3 }
   0xc   : > { %p61_p7 = scmp.eq.s32.totalorder %s625_s10, 1  ;;  %p67_p8 = scmp.eq.s32.totalorder %s422_s11, 1 }
   0xd   : > { %p454_p10 = scmp.lt.s32.totalorder %s588_s9, 2  ;;  %s87_s20 = sand.u32 1, %s584_s8  }
   0xe   : > { %p654_p11 = por %p61_p7, %p31_p0  ;;  %p658_p12 = por %p67_p8, %p37_p3 }
   0xf   : > { %s439_s21 = sshll.u32 %s588_s9, 9  ;;  %s425_s22 = sshll.u32 %s87_s20, 9 }
  0x10   : > { %s97_s25 = scalar_lea.hbm %s864_s0, %s439_s21  ;;  %s91_s27 = scalar_lea.vmem [#allocation2], %s425_s22 }
  0x11   : > { %s98_s26 = sshll.u32 %s97_s25, 4  ;;  %s100_s28 = sshll.u32 %s91_s27, 4  ;;  %s99_s26 = int_to_ptr.hbm [resolvable:$true] %s98_s26  ;;  %s101_s28 = int_to_ptr.vmem [resolvable:$true] %s100_s28 }
  0x12   : > { %p669_p13 = pnand %p454_p10, %p643_p5  ;;  %p429_p0 = scmp.ge.s32.totalorder %s588_s9, 1 }
  0x13   : > { %p108_p1 = scmp.lt.s32.totalorder %s588_s9, 3  ;;  %s88_s30 = scalar_lea.sflag [#allocation3], %s87_s20 }
  0x14   : > { %s492_s2 = sshra.s32 %s99_s26, 4  ;;  %p496_p3 = pneg %p669_p13  ;;  %s493_s2 = int_to_ptr.hbm [resolvable:$true] %s492_s2 }
  0x15   : > { %s494_s3 = scalar_lea.hbm %s493_s2, 512  ;;  %s499_s11 = scalar_lea.hbm %s864_s0, 1024 }
  0x16   : > { %p495_p2 = scmp.ne.s32.totalorder %s493_s2, %s494_s3  ;;  %p500_p5 = scmp.lt.s32.totalorder %s493_s2, %s864_s0 }
  0x17   : > { %p501_p8 = scmp.lt.s32.totalorder %s499_s11, %s494_s3 }
  0x18   : > { %p497_p4 = pnand %p496_p3, %p495_p2 }
  0x19   : > { %p502_p10 = por %p501_p8, %p500_p5 }
  0x1a   : > { %p498_p7 = pneg %p497_p4 }
  0x1c   : > { %p503_p9 = pnand %p502_p10, %p498_p7 }
  0x1e   : > { %506 = shalt.err (!%p503_p9)
}
  0x1f   : > { %s590_s16 = smov 1024   ;;  %s591_s20 = smov 64  }
  0x20   : > { %449 = dma.hbm_to_vmem [thread:$0]  (!%p669_p13), %s99_s26, 8192, %s101_s28, %s88_s30, %s590_s16, %s590_s16, %s591_s20  }
  0x21   : > { %p109_p2 = pnand %p429_p0, %p108_p1 }
  0x22   : > { %s690_s21 = sand.u32 (!%p109_p2), 1, %s580_s7  }
  0x23   : > { %112 = sbr.rel (%p109_p2) target bundleno = 111 (0x6f), region = 24  ;;  %s430_s22 = sshll.u32 (!%p109_p2), %s690_s21, 9 }
  0x24   : > { %s115_s23 = scalar_lea.sflag (!%p109_p2), [#allocation3], %s690_s21  ;;  %s694_s24 = scalar_lea.vmem (!%p109_p2), [#allocation2], %s430_s22 }
  0x28   : > { %567 = dma.done.wait (%p647_p6), %s115_s23, 8192  }
  0x29   : > { %569 = vsyncadd (%p647_p6), %s115_s23, 4294959104  ;;  %v140_v0 = vld [vmem:[%s694_s24] sm:$0xff]  ;;  %v141_v1 = vld [vmem:[%s694_s24 + $0x8] sm:$0xff]  ;;  %s706_s17 = scalar_lea.vmem [#allocation5], %s430_s22  ;;  %s441_s25 = sshll.u32 %s625_s10, 9 }
  0x2a   : > { %v142_v2 = vld [vmem:[%s694_s24 + $0x10] sm:$0xff]  ;;  %v204_v3 = vmul.f32 37060.0, %v140_v0  ;;  %v205_v4 = vmul.f32 37060.0, %v141_v1  ;;  %v143_v6 = vld [vmem:[%s694_s24 + $0x18] sm:$0xff]  ;;  %s345_s28 = scalar_lea.hbm %s865_s1, %s441_s25 }
  0x2b   : > { %v206_v5 = vmul.f32 37060.0, %v142_v2  ;;  %v144_v7 = vld [vmem:[%s694_s24 + $0x20] sm:$0xff]  ;;  %v145_v8 = vld [vmem:[%s694_s24 + $0x28] sm:$0xff]  ;;  %v207_v9 = vmul.f32 37060.0, %v143_v6 }
  0x2c   : > { %268 = vst [vmem:[%s706_s17] sm:$0xff] %v204_v3  ;;  %v208_v10 = vmul.f32 37060.0, %v144_v7  ;;  %v209_v11 = vmul.f32 37060.0, %v145_v8  ;;  %v146_v12 = vld [vmem:[%s694_s24 + $0x30] sm:$0xff]  ;;  %v147_v13 = vld [vmem:[%s694_s24 + $0x38] sm:$0xff] }
  0x2d   : > { %269 = vst [vmem:[%s706_s17 + $0x8] sm:$0xff] %v205_v4  ;;  %v148_v14 = vld [vmem:[%s694_s24 + $0x40] sm:$0xff]  ;;  %v210_v15 = vmul.f32 37060.0, %v146_v12  ;;  %v149_v16 = vld [vmem:[%s694_s24 + $0x48] sm:$0xff]  ;;  %v150_v18 = vld [vmem:[%s694_s24 + $0x50] sm:$0xff] }
  0x2e   : > { %270 = vst [vmem:[%s706_s17 + $0x10] sm:$0xff] %v206_v5  ;;  %v211_v17 = vmul.f32 37060.0, %v147_v13  ;;  %v212_v19 = vmul.f32 37060.0, %v148_v14  ;;  %v151_v20 = vld [vmem:[%s694_s24 + $0x58] sm:$0xff] }
  0x2f   : > { %271 = vst [vmem:[%s706_s17 + $0x18] sm:$0xff] %v207_v9  ;;  %v213_v21 = vmul.f32 37060.0, %v149_v16  ;;  %v152_v22 = vld [vmem:[%s694_s24 + $0x60] sm:$0xff]  ;;  %v214_v23 = vmul.f32 37060.0, %v150_v18 }
  0x30   : > { %272 = vst [vmem:[%s706_s17 + $0x20] sm:$0xff] %v208_v10  ;;  %v153_v24 = vld [vmem:[%s694_s24 + $0x68] sm:$0xff]  ;;  %v215_v25 = vmul.f32 37060.0, %v151_v20  ;;  %v154_v26 = vld [vmem:[%s694_s24 + $0x70] sm:$0xff]  ;;  %v155_v28 = vld [vmem:[%s694_s24 + $0x78] sm:$0xff] }
  0x31   : > { %273 = vst [vmem:[%s706_s17 + $0x28] sm:$0xff] %v209_v11  ;;  %v216_v27 = vmul.f32 37060.0, %v152_v22  ;;  %v217_v29 = vmul.f32 37060.0, %v153_v24  ;;  %v156_v30 = vld [vmem:[%s694_s24 + $0x80] sm:$0xff] }
  0x32   : > { %274 = vst [vmem:[%s706_s17 + $0x30] sm:$0xff] %v210_v15  ;;  %v218_v31 = vmul.f32 37060.0, %v154_v26  ;;  %v157_v32 = vld [vmem:[%s694_s24 + $0x88] sm:$0xff]  ;;  %v219_v33 = vmul.f32 37060.0, %v155_v28 }
  0x33   : > { %275 = vst [vmem:[%s706_s17 + $0x38] sm:$0xff] %v211_v17  ;;  %v158_v34 = vld [vmem:[%s694_s24 + $0x90] sm:$0xff]  ;;  %v220_v35 = vmul.f32 37060.0, %v156_v30  ;;  %v159_v36 = vld [vmem:[%s694_s24 + $0x98] sm:$0xff]  ;;  %v160_v38 = vld [vmem:[%s694_s24 + $0xa0] sm:$0xff] }
  0x34   : > { %276 = vst [vmem:[%s706_s17 + $0x40] sm:$0xff] %v212_v19  ;;  %v221_v37 = vmul.f32 37060.0, %v157_v32  ;;  %v222_v39 = vmul.f32 37060.0, %v158_v34  ;;  %v161_v40 = vld [vmem:[%s694_s24 + $0xa8] sm:$0xff] }
  0x35   : > { %277 = vst [vmem:[%s706_s17 + $0x48] sm:$0xff] %v213_v21  ;;  %v223_v41 = vmul.f32 37060.0, %v159_v36  ;;  %v162_v42 = vld [vmem:[%s694_s24 + $0xb0] sm:$0xff]  ;;  %v224_v43 = vmul.f32 37060.0, %v160_v38 }
  0x36   : > { %278 = vst [vmem:[%s706_s17 + $0x50] sm:$0xff] %v214_v23  ;;  %v163_v44 = vld [vmem:[%s694_s24 + $0xb8] sm:$0xff]  ;;  %v225_v45 = vmul.f32 37060.0, %v161_v40  ;;  %v164_v46 = vld [vmem:[%s694_s24 + $0xc0] sm:$0xff]  ;;  %v165_v48 = vld [vmem:[%s694_s24 + $0xc8] sm:$0xff] }
  0x37   : > { %279 = vst [vmem:[%s706_s17 + $0x58] sm:$0xff] %v215_v25  ;;  %v226_v47 = vmul.f32 37060.0, %v162_v42  ;;  %v227_v49 = vmul.f32 37060.0, %v163_v44  ;;  %v166_v50 = vld [vmem:[%s694_s24 + $0xd0] sm:$0xff] }
  0x38   : > { %280 = vst [vmem:[%s706_s17 + $0x60] sm:$0xff] %v216_v27  ;;  %v228_v51 = vmul.f32 37060.0, %v164_v46  ;;  %v167_v52 = vld [vmem:[%s694_s24 + $0xd8] sm:$0xff]  ;;  %v229_v53 = vmul.f32 37060.0, %v165_v48 }
  0x39   : > { %281 = vst [vmem:[%s706_s17 + $0x68] sm:$0xff] %v217_v29  ;;  %v168_v54 = vld [vmem:[%s694_s24 + $0xe0] sm:$0xff]  ;;  %v230_v55 = vmul.f32 37060.0, %v166_v50  ;;  %v169_v56 = vld [vmem:[%s694_s24 + $0xe8] sm:$0xff]  ;;  %v170_v58 = vld [vmem:[%s694_s24 + $0xf0] sm:$0xff] }
  0x3a   : > { %282 = vst [vmem:[%s706_s17 + $0x70] sm:$0xff] %v218_v31  ;;  %v231_v57 = vmul.f32 37060.0, %v167_v52  ;;  %v232_v59 = vmul.f32 37060.0, %v168_v54  ;;  %v171_v60 = vld [vmem:[%s694_s24 + $0xf8] sm:$0xff] }
  0x3b   : > { %283 = vst [vmem:[%s706_s17 + $0x78] sm:$0xff] %v219_v33  ;;  %v233_v61 = vmul.f32 37060.0, %v169_v56  ;;  %v172_v62 = vld [vmem:[%s694_s24 + $0x100] sm:$0xff]  ;;  %v234_v63 = vmul.f32 37060.0, %v170_v58 }
  0x3c   : > { %284 = vst [vmem:[%s706_s17 + $0x80] sm:$0xff] %v220_v35  ;;  %v173_v0 = vld [vmem:[%s694_s24 + $0x108] sm:$0xff]  ;;  %v235_v1 = vmul.f32 37060.0, %v171_v60  ;;  %v174_v2 = vld [vmem:[%s694_s24 + $0x110] sm:$0xff]  ;;  %v175_v4 = vld [vmem:[%s694_s24 + $0x118] sm:$0xff] }
  0x3d   : > { %285 = vst [vmem:[%s706_s17 + $0x88] sm:$0xff] %v221_v37  ;;  %v236_v3 = vmul.f32 37060.0, %v172_v62  ;;  %v237_v5 = vmul.f32 37060.0, %v173_v0  ;;  %v176_v6 = vld [vmem:[%s694_s24 + $0x120] sm:$0xff] }
  0x3e   : > { %286 = vst [vmem:[%s706_s17 + $0x90] sm:$0xff] %v222_v39  ;;  %v238_v7 = vmul.f32 37060.0, %v174_v2  ;;  %v177_v8 = vld [vmem:[%s694_s24 + $0x128] sm:$0xff]  ;;  %v239_v9 = vmul.f32 37060.0, %v175_v4 }
  0x3f   : > { %287 = vst [vmem:[%s706_s17 + $0x98] sm:$0xff] %v223_v41  ;;  %v178_v10 = vld [vmem:[%s694_s24 + $0x130] sm:$0xff]  ;;  %v240_v11 = vmul.f32 37060.0, %v176_v6  ;;  %v179_v12 = vld [vmem:[%s694_s24 + $0x138] sm:$0xff]  ;;  %v180_v14 = vld [vmem:[%s694_s24 + $0x140] sm:$0xff] }
  0x40   : > { %288 = vst [vmem:[%s706_s17 + $0xa0] sm:$0xff] %v224_v43  ;;  %v241_v13 = vmul.f32 37060.0, %v177_v8  ;;  %v242_v15 = vmul.f32 37060.0, %v178_v10  ;;  %v181_v16 = vld [vmem:[%s694_s24 + $0x148] sm:$0xff] }
  0x41   : > { %289 = vst [vmem:[%s706_s17 + $0xa8] sm:$0xff] %v225_v45  ;;  %v243_v17 = vmul.f32 37060.0, %v179_v12  ;;  %v182_v18 = vld [vmem:[%s694_s24 + $0x150] sm:$0xff]  ;;  %v244_v19 = vmul.f32 37060.0, %v180_v14 }
  0x42   : > { %290 = vst [vmem:[%s706_s17 + $0xb0] sm:$0xff] %v226_v47  ;;  %v183_v20 = vld [vmem:[%s694_s24 + $0x158] sm:$0xff]  ;;  %v245_v21 = vmul.f32 37060.0, %v181_v16  ;;  %v184_v22 = vld [vmem:[%s694_s24 + $0x160] sm:$0xff]  ;;  %v185_v24 = vld [vmem:[%s694_s24 + $0x168] sm:$0xff] }
  0x43   : > { %291 = vst [vmem:[%s706_s17 + $0xb8] sm:$0xff] %v227_v49  ;;  %v246_v23 = vmul.f32 37060.0, %v182_v18  ;;  %v247_v25 = vmul.f32 37060.0, %v183_v20  ;;  %v186_v26 = vld [vmem:[%s694_s24 + $0x170] sm:$0xff] }
  0x44   : > { %292 = vst [vmem:[%s706_s17 + $0xc0] sm:$0xff] %v228_v51  ;;  %v248_v27 = vmul.f32 37060.0, %v184_v22  ;;  %v187_v28 = vld [vmem:[%s694_s24 + $0x178] sm:$0xff]  ;;  %v249_v29 = vmul.f32 37060.0, %v185_v24 }
  0x45   : > { %293 = vst [vmem:[%s706_s17 + $0xc8] sm:$0xff] %v229_v53  ;;  %v188_v30 = vld [vmem:[%s694_s24 + $0x180] sm:$0xff]  ;;  %v250_v31 = vmul.f32 37060.0, %v186_v26  ;;  %v189_v32 = vld [vmem:[%s694_s24 + $0x188] sm:$0xff]  ;;  %v190_v34 = vld [vmem:[%s694_s24 + $0x190] sm:$0xff] }
  0x46   : > { %294 = vst [vmem:[%s706_s17 + $0xd0] sm:$0xff] %v230_v55  ;;  %v251_v33 = vmul.f32 37060.0, %v187_v28  ;;  %v252_v35 = vmul.f32 37060.0, %v188_v30  ;;  %v191_v36 = vld [vmem:[%s694_s24 + $0x198] sm:$0xff] }
  0x47   : > { %295 = vst [vmem:[%s706_s17 + $0xd8] sm:$0xff] %v231_v57  ;;  %v253_v37 = vmul.f32 37060.0, %v189_v32  ;;  %v192_v38 = vld [vmem:[%s694_s24 + $0x1a0] sm:$0xff]  ;;  %v254_v39 = vmul.f32 37060.0, %v190_v34 }
  0x48   : > { %296 = vst [vmem:[%s706_s17 + $0xe0] sm:$0xff] %v232_v59  ;;  %v193_v40 = vld [vmem:[%s694_s24 + $0x1a8] sm:$0xff]  ;;  %v255_v41 = vmul.f32 37060.0, %v191_v36  ;;  %v194_v42 = vld [vmem:[%s694_s24 + $0x1b0] sm:$0xff]  ;;  %v195_v44 = vld [vmem:[%s694_s24 + $0x1b8] sm:$0xff] }
  0x49   : > { %297 = vst [vmem:[%s706_s17 + $0xe8] sm:$0xff] %v233_v61  ;;  %v256_v43 = vmul.f32 37060.0, %v192_v38  ;;  %v257_v45 = vmul.f32 37060.0, %v193_v40  ;;  %v196_v46 = vld [vmem:[%s694_s24 + $0x1c0] sm:$0xff] }
  0x4a   : > { %298 = vst [vmem:[%s706_s17 + $0xf0] sm:$0xff] %v234_v63  ;;  %v258_v47 = vmul.f32 37060.0, %v194_v42  ;;  %v197_v48 = vld [vmem:[%s694_s24 + $0x1c8] sm:$0xff]  ;;  %v259_v49 = vmul.f32 37060.0, %v195_v44 }
  0x4b   : > { %299 = vst [vmem:[%s706_s17 + $0xf8] sm:$0xff] %v235_v1  ;;  %v198_v50 = vld [vmem:[%s694_s24 + $0x1d0] sm:$0xff]  ;;  %v260_v51 = vmul.f32 37060.0, %v196_v46  ;;  %v199_v52 = vld [vmem:[%s694_s24 + $0x1d8] sm:$0xff]  ;;  %v200_v54 = vld [vmem:[%s694_s24 + $0x1e0] sm:$0xff] }
  0x4c   : > { %300 = vst [vmem:[%s706_s17 + $0x100] sm:$0xff] %v236_v3  ;;  %v261_v53 = vmul.f32 37060.0, %v197_v48  ;;  %v262_v55 = vmul.f32 37060.0, %v198_v50  ;;  %v201_v56 = vld [vmem:[%s694_s24 + $0x1e8] sm:$0xff] }
  0x4d   : > { %301 = vst [vmem:[%s706_s17 + $0x108] sm:$0xff] %v237_v5  ;;  %v263_v57 = vmul.f32 37060.0, %v199_v52  ;;  %v202_v58 = vld [vmem:[%s694_s24 + $0x1f0] sm:$0xff]  ;;  %v264_v59 = vmul.f32 37060.0, %v200_v54 }
  0x4e   : > { %302 = vst [vmem:[%s706_s17 + $0x110] sm:$0xff] %v238_v7  ;;  %v203_v60 = vld [vmem:[%s694_s24 + $0x1f8] sm:$0xff]  ;;  %v265_v61 = vmul.f32 37060.0, %v201_v56  ;;  %s346_s10 = sshll.u32 %s706_s17, 4  ;;  %s348_s29 = sshll.u32 %s345_s28, 4  ;;  %s347_s10 = int_to_ptr.vmem [resolvable:$true] %s346_s10  ;;  %s349_s29 = int_to_ptr.hbm [resolvable:$true] %s348_s29 }
  0x4f   : > { %303 = vst [vmem:[%s706_s17 + $0x118] sm:$0xff] %v239_v9  ;;  %v266_v62 = vmul.f32 37060.0, %v202_v58  ;;  %v267_v63 = vmul.f32 37060.0, %v203_v60  ;;  %s333_s30 = scalar_lea.sflag [#allocation4], %s690_s21 }
  0x50   : > { %304 = vst [vmem:[%s706_s17 + $0x120] sm:$0xff] %v240_v11  ;;  %s536_s2 = sshra.s32 %s349_s29, 4  ;;  %s542_s11 = scalar_lea.hbm %s865_s1, 1024  ;;  %s537_s2 = int_to_ptr.hbm [resolvable:$true] %s536_s2 }
  0x51   : > { %305 = vst [vmem:[%s706_s17 + $0x128] sm:$0xff] %v241_v13  ;;  %s538_s3 = scalar_lea.hbm %s537_s2, 512  ;;  %p543_p0 = scmp.lt.s32.totalorder %s537_s2, %s865_s1 }
  0x52   : > { %306 = vst [vmem:[%s706_s17 + $0x130] sm:$0xff] %v242_v15  ;;  %p539_p6 = scmp.ne.s32.totalorder %s537_s2, %s538_s3  ;;  %p544_p1 = scmp.lt.s32.totalorder %s542_s11, %s538_s3 }
  0x53   : > { %307 = vst [vmem:[%s706_s17 + $0x138] sm:$0xff] %v243_v17 }
  0x54   : > { %308 = vst [vmem:[%s706_s17 + $0x140] sm:$0xff] %v244_v19  ;;  %p540_p9 = pnand %p539_p6, %p654_p11  ;;  %p545_p3 = por %p544_p1, %p543_p0 }
  0x55   : > { %309 = vst [vmem:[%s706_s17 + $0x148] sm:$0xff] %v245_v21 }
  0x56   : > { %310 = vst [vmem:[%s706_s17 + $0x150] sm:$0xff] %v246_v23  ;;  %p541_p13 = pneg %p540_p9 }
  0x57   : > { %311 = vst [vmem:[%s706_s17 + $0x158] sm:$0xff] %v247_v25 }
  0x58   : > { %312 = vst [vmem:[%s706_s17 + $0x160] sm:$0xff] %v248_v27  ;;  %p546_p4 = pnand %p545_p3, %p541_p13 }
  0x59   : > { %313 = vst [vmem:[%s706_s17 + $0x168] sm:$0xff] %v249_v29 }
  0x5a   : > { %314 = vst [vmem:[%s706_s17 + $0x170] sm:$0xff] %v250_v31 }
  0x5b   : > { %315 = vst [vmem:[%s706_s17 + $0x178] sm:$0xff] %v251_v33 }
  0x5c   : > { %316 = vst [vmem:[%s706_s17 + $0x180] sm:$0xff] %v252_v35 }
  0x5d   : > { %317 = vst [vmem:[%s706_s17 + $0x188] sm:$0xff] %v253_v37 }
  0x5e   : > { %318 = vst [vmem:[%s706_s17 + $0x190] sm:$0xff] %v254_v39 }
  0x5f   : > { %319 = vst [vmem:[%s706_s17 + $0x198] sm:$0xff] %v255_v41 }
  0x60   : > { %320 = vst [vmem:[%s706_s17 + $0x1a0] sm:$0xff] %v256_v43 }
  0x61   : > { %321 = vst [vmem:[%s706_s17 + $0x1a8] sm:$0xff] %v257_v45 }
  0x62   : > { %322 = vst [vmem:[%s706_s17 + $0x1b0] sm:$0xff] %v258_v47 }
  0x63   : > { %323 = vst [vmem:[%s706_s17 + $0x1b8] sm:$0xff] %v259_v49 }
  0x64   : > { %324 = vst [vmem:[%s706_s17 + $0x1c0] sm:$0xff] %v260_v51 }
  0x65   : > { %325 = vst [vmem:[%s706_s17 + $0x1c8] sm:$0xff] %v261_v53 }
  0x66   : > { %326 = vst [vmem:[%s706_s17 + $0x1d0] sm:$0xff] %v262_v55 }
  0x67   : > { %327 = vst [vmem:[%s706_s17 + $0x1d8] sm:$0xff] %v263_v57 }
  0x68   : > { %328 = vst [vmem:[%s706_s17 + $0x1e0] sm:$0xff] %v264_v59 }
  0x69   : > { %329 = vst [vmem:[%s706_s17 + $0x1e8] sm:$0xff] %v265_v61 }
  0x6a   : > { %330 = vst [vmem:[%s706_s17 + $0x1f0] sm:$0xff] %v266_v62 }
  0x6b   : > { %331 = vst [vmem:[%s706_s17 + $0x1f8] sm:$0xff] %v267_v63 }
  0x6c   : > { %549 = shalt.err (!%p546_p4)
}
  0x6d   : > { %s592_s16 = smov 1024   ;;  %s593_s20 = smov 64  }
  0x6e   : > { %444 = dma.vmem_to_hbm [thread:$0]  (%p654_p11), %s347_s10, 8192, %s349_s29, %s333_s30, %s592_s16, %s592_s16, %s593_s20  }
  0x6f PF: > { %s363_s21 = sand.u32 1, %s576_s6   ;;  %p871_p7 = scmp.ge.s32.totalorder %s588_s9, 2 }
  0x70   : > { %s364_s22 = scalar_lea.sflag [#allocation4], %s363_s21 }
  0x71   : > { %p451_p5 = pnand %p871_p7, %p658_p12 }
  0x73   : > { %p452_p8 = pneg %p451_p5 }
  0x75   : > { %571 = dma.done.wait (%p452_p8), %s364_s22, 8192  }
  0x76   : > { %573 = vsyncadd (%p452_p8), %s364_s22, 4294959104  ;;  %p14_p10 = scmp.ge.s32.totalorder %s629_s12, 4   ;;  %s872_s6 = smov %s580_s7 }
  0x77   : > { %s873_s7 = smov %s584_s8  ;;  %s874_s8 = smov %s641_s15 }
  0x78   : > { %s875_s9 = smov %s629_s12  ;;  %16 = sbr.rel (!%p14_p10) target bundleno = 5 (0x5), region = 69 }
  0x7d   :  { %370 = vsyncpa [#allocation3], 1 }
  0x7e   :  { %372 = vsyncpa [#allocation3 + $0x1], 1 }
  0x7f   :  { %373 = vsyncpa [#allocation4], 1 }
  0x80   :  { %375 = vsyncpa [#allocation4 + $0x1], 1 }

</bundles_post_ra>
